<compile_context>
chip_gen: v7x
topology: tpu7x:2x2x1
jax: 0.10.0
libtpu: 0.0.40
codegen_flags: <defaults>
</compile_context>

<pallas_src>
import functools

import jax
import jax.numpy as jnp
from jax.experimental import pallas as pl
from jax.experimental.pallas import tpu as pltpu

H1 = 128
H2 = 128


def _actor_kernel(x_ref, w1_ref, b1_ref, w2_ref, b2_ref, w3_ref, b3_ref, o_ref,
                  *, max_act, bf16_elem):
    # x: (TB, s_dim) f32 | w*: bf16 | b*: (1, out) f32 | o: (TB, a_dim) f32
    x = x_ref[...].astype(jnp.bfloat16)

    h1 = jnp.dot(x, w1_ref[...], preferred_element_type=jnp.float32) + b1_ref[...]
    if bf16_elem:
        # bf16 ReLU halves VALU/vreg traffic on v6e/v7x (bf16-capable VPU).
        h1 = jnp.maximum(h1.astype(jnp.bfloat16), jnp.bfloat16(0.0))
    else:
        # v5e VPU has no bf16: keep elementwise in f32, cast afterwards.
        h1 = jnp.maximum(h1, 0.0).astype(jnp.bfloat16)

    h2 = jnp.dot(h1, w2_ref[...], preferred_element_type=jnp.float32) + b2_ref[...]
    if bf16_elem:
        h2 = jnp.maximum(h2.astype(jnp.bfloat16), jnp.bfloat16(0.0))
    else:
        h2 = jnp.maximum(h2, 0.0).astype(jnp.bfloat16)

    out = jnp.dot(h2, w3_ref[...], preferred_element_type=jnp.float32) + b3_ref[...]
    # tanh on the EUP, then static scale by max_act.
    o_ref[...] = (jnp.tanh(out) * max_act).astype(o_ref.dtype)


def _round_up(n, m):
    return ((n + m - 1) // m) * m


def _device_kind():
    try:
        return jax.devices()[0].device_kind.lower()
    except Exception:
        return ""


def _default_bf16_elementwise():
    # v5e's VPU has no native bf16; keep its elementwise chain in f32.
    kind = _device_kind()
    is_v5e = ("v5 lite" in kind) or ("v5lite" in kind) or ("v5e" in kind)
    return not is_v5e


def _chip_tensorcores():
    # Dual-TensorCore chips (v7x / v5p / v4 megacore) want >= 2 grid blocks;
    # the lite chips (v5e / v6e) have a single TensorCore.
    kind = _device_kind()
    single = (("v5 lite" in kind) or ("v5lite" in kind) or ("v5e" in kind) or
              ("v6 lite" in kind) or ("v6lite" in kind) or ("v6e" in kind))
    return 1 if single else 2


def actor_forward(state, params, max_act, *, block_b=2048, bf16_elementwise=None):
    """state: (B, s_dim) f32 -> action: (B, a_dim) f32 = tanh(MLP(state)) * max_act."""
    w1, b1, w2, b2, w3, b3 = params
    B, s_dim = state.shape
    a_dim = w3.shape[1]

    if bf16_elementwise is None:
        bf16_elementwise = _default_bf16_elementwise()

    # Batch tile: 8-sublane aligned, as big as block_b allows (amortizes the
    # ~0.35 us/step pipeline overhead). On dual-TC chips keep at least one
    # block per TensorCore so the "parallel" batch axis feeds both cores.
    tb = min(block_b, _round_up(B, 8))
    n_cores = _chip_tensorcores()
    if n_cores > 1 and B > 8 * n_cores:
        tb = min(tb, _round_up(pl.cdiv(B, n_cores), 8))
    n_blocks = pl.cdiv(B, tb)  # trailing partial block: OOB writes are masked

    # Weights/biases: constant block index -> fetched once, VMEM-resident.
    const = lambda a: pl.BlockSpec(a.shape, lambda i: (0, 0))

    flops = 2 * B * (s_dim * H1 + H1 * H2 + H2 * a_dim)
    bytes_accessed = (
        B * s_dim * state.dtype.itemsize
        + sum(int(p.size) * p.dtype.itemsize for p in params)
        + B * a_dim * 4
    )
    cost = pl.CostEstimate(flops=flops,
                           transcendentals=B * a_dim,
                           bytes_accessed=bytes_accessed)

    # max_act is baked in as a static compile-time constant (a fixed Actor
    # hyper-parameter). If it ever needs to be traced / varied without
    # recompiling, pass it as an SMEM scalar input instead.
    return pl.pallas_call(
        functools.partial(_actor_kernel, max_act=float(max_act),
                          bf16_elem=bool(bf16_elementwise)),
        out_shape=jax.ShapeDtypeStruct((B, a_dim), jnp.float32),
        grid=(n_blocks,),
        in_specs=[
            pl.BlockSpec((tb, s_dim), lambda i: (i, 0)),   # state: tiled over batch
            const(w1), const(b1),
            const(w2), const(b2),
            const(w3), const(b3),
        ],
        out_specs=pl.BlockSpec((tb, a_dim), lambda i: (i, 0)),
        compiler_params=pltpu.CompilerParams(
            dimension_semantics=("parallel",),      # shard batch over TCs
            vmem_limit_bytes=32 * 1024 * 1024,      # safe on v5e/v6e/v7x
        ),
        cost_estimate=cost,
    )(state, w1, b1, w2, b2, w3, b3)


def init_actor_params(key, s_dim, a_dim, h1=H1, h2=H2):
    """torch.nn.Linear-style init (U[-1/sqrt(fan_in), 1/sqrt(fan_in)]).

    Weights stored (in_features, out_features) in bf16; biases (1, out) in f32.
    """
    ks = jax.random.split(key, 6)

    def lin(kw, kb, fan_in, fan_out):
        bound = 1.0 / jnp.sqrt(jnp.float32(fan_in))
        w = jax.random.uniform(kw, (fan_in, fan_out), jnp.float32, -bound, bound)
        b = jax.random.uniform(kb, (1, fan_out), jnp.float32, -bound, bound)
        return w.astype(jnp.bfloat16), b

    w1, b1 = lin(ks[0], ks[1], s_dim, h1)
    w2, b2 = lin(ks[2], ks[3], h1, h2)
    w3, b3 = lin(ks[4], ks[5], h2, a_dim)
    return (w1, b1, w2, b2, w3, b3)


def _reference_forward(state, params, max_act):
    """Pure-JAX reference with identical bf16-operand / f32-accumulate precision."""
    w1, b1, w2, b2, w3, b3 = params
    x = state.astype(jnp.bfloat16)
    h1 = jnp.maximum(jnp.dot(x, w1, preferred_element_type=jnp.float32) + b1, 0.0)
    h2 = jnp.maximum(
        jnp.dot(h1.astype(jnp.bfloat16), w2, preferred_element_type=jnp.float32) + b2, 0.0)
    out = jnp.dot(h2.astype(jnp.bfloat16), w3, preferred_element_type=jnp.float32) + b3
    return jnp.tanh(out) * max_act


if __name__ == "__main__":
    key = jax.random.PRNGKey(0)
    k_s, k_s2, k_p = jax.random.split(key, 3)

    s_dim, a_dim, max_act = 24, 8, 2.0
    params = init_actor_params(k_p, s_dim, a_dim)

    # Small batch: single grid step, auto-selected elementwise path.
    state = jax.random.normal(k_s, (8, s_dim), jnp.float32)
    out = jax.block_until_ready(actor_forward(state, params, max_act))
    ref = _reference_forward(state, params, max_act)
    assert out.shape == (8, a_dim)
    assert jnp.allclose(out, ref, atol=1e-3, rtol=1e-3), "mismatch vs reference (B=8)"

    # Ragged batch with several grid steps and a partial trailing block
    # (masked OOB writes, no wrapper pad/slice); also exercises the other
    # elementwise path so both kernel variants are checked.
    state2 = jax.random.normal(k_s2, (37, s_dim), jnp.float32)
    out2 = jax.block_until_ready(
        actor_forward(state2, params, max_act, block_b=16,
                      bf16_elementwise=not _default_bf16_elementwise()))
    ref2 = _reference_forward(state2, params, max_act)
    assert out2.shape == (37, a_dim)
    assert jnp.allclose(out2, ref2, atol=1e-3, rtol=1e-3), "mismatch vs reference (B=37)"

    print("KERNEL_OK")
</pallas_src>

<mosaic_0001>
module attributes {stable_mosaic.version = 11 : i64} {
  func.func @_actor_kernel(%arg0: i32, %arg1: memref<8x24xf32, #tpu.memory_space<vmem>>, %arg2: memref<24x128xbf16, #tpu.memory_space<vmem>>, %arg3: memref<1x128xf32, #tpu.memory_space<vmem>>, %arg4: memref<128x128xbf16, #tpu.memory_space<vmem>>, %arg5: memref<1x128xf32, #tpu.memory_space<vmem>>, %arg6: memref<128x8xbf16, #tpu.memory_space<vmem>>, %arg7: memref<1x8xf32, #tpu.memory_space<vmem>>, %arg8: memref<8x8xf32, #tpu.memory_space<vmem>>) attributes {dimension_semantics = [#tpu.dimension_semantics<parallel>], iteration_bounds = array<i64: 1>, scalar_prefetch = 0 : i64, scratch_operands = 0 : i64, tpu.core_type = #tpu.core_type<tc>, window_params = [{transform_indices = @transform_0, window_bounds = array<i64: 8, 24>}, {pipeline_mode = #tpu.pipeline_mode<synchronous>, transform_indices = @transform_1, window_bounds = array<i64: 24, 128>}, {pipeline_mode = #tpu.pipeline_mode<synchronous>, transform_indices = @transform_2, window_bounds = array<i64: 1, 128>}, {pipeline_mode = #tpu.pipeline_mode<synchronous>, transform_indices = @transform_3, window_bounds = array<i64: 128, 128>}, {pipeline_mode = #tpu.pipeline_mode<synchronous>, transform_indices = @transform_4, window_bounds = array<i64: 1, 128>}, {pipeline_mode = #tpu.pipeline_mode<synchronous>, transform_indices = @transform_5, window_bounds = array<i64: 128, 8>}, {pipeline_mode = #tpu.pipeline_mode<synchronous>, transform_indices = @transform_6, window_bounds = array<i64: 1, 8>}, {transform_indices = @transform_7, window_bounds = array<i64: 8, 8>}]} {
    %c0 = arith.constant 0 : index
    %c0_0 = arith.constant 0 : index
    %0 = vector.load %arg1[%c0, %c0_0] : memref<8x24xf32, #tpu.memory_space<vmem>>, vector<8x24xf32>
    %1 = arith.truncf %0 : vector<8x24xf32> to vector<8x24xbf16>
    %c0_1 = arith.constant 0 : index
    %c0_2 = arith.constant 0 : index
    %2 = vector.load %arg2[%c0_1, %c0_2] : memref<24x128xbf16, #tpu.memory_space<vmem>>, vector<24x128xbf16>
    %cst = arith.constant dense<0.000000e+00> : vector<8x128xf32>
    %3 = tpu.matmul %1, %2, %cst {dimension_numbers = #tpu.dot_dimension_numbers<[1], [0], [0], [1], [0, 0, 1, 1], [], []>} : vector<8x24xbf16>, vector<24x128xbf16>, vector<8x128xf32> -> vector<8x128xf32>
    %c0_3 = arith.constant 0 : index
    %c0_4 = arith.constant 0 : index
    %4 = vector.load %arg3[%c0_3, %c0_4] : memref<1x128xf32, #tpu.memory_space<vmem>>, vector<1x128xf32>
    %5 = vector.broadcast %4 : vector<1x128xf32> to vector<8x128xf32>
    %6 = arith.addf %3, %5 : vector<8x128xf32>
    %7 = arith.truncf %6 : vector<8x128xf32> to vector<8x128xbf16>
    %cst_5 = arith.constant 0.000000e+00 : bf16
    %8 = vector.broadcast %cst_5 : bf16 to vector<8x128xbf16>
    %9 = arith.maximumf %7, %8 : vector<8x128xbf16>
    %c0_6 = arith.constant 0 : index
    %c0_7 = arith.constant 0 : index
    %10 = vector.load %arg4[%c0_6, %c0_7] : memref<128x128xbf16, #tpu.memory_space<vmem>>, vector<128x128xbf16>
    %cst_8 = arith.constant dense<0.000000e+00> : vector<8x128xf32>
    %11 = tpu.matmul %9, %10, %cst_8 {dimension_numbers = #tpu.dot_dimension_numbers<[1], [0], [0], [1], [0, 0, 1, 1], [], []>} : vector<8x128xbf16>, vector<128x128xbf16>, vector<8x128xf32> -> vector<8x128xf32>
    %c0_9 = arith.constant 0 : index
    %c0_10 = arith.constant 0 : index
    %12 = vector.load %arg5[%c0_9, %c0_10] : memref<1x128xf32, #tpu.memory_space<vmem>>, vector<1x128xf32>
    %13 = vector.broadcast %12 : vector<1x128xf32> to vector<8x128xf32>
    %14 = arith.addf %11, %13 : vector<8x128xf32>
    %15 = arith.truncf %14 : vector<8x128xf32> to vector<8x128xbf16>
    %cst_11 = arith.constant 0.000000e+00 : bf16
    %16 = vector.broadcast %cst_11 : bf16 to vector<8x128xbf16>
    %17 = arith.maximumf %15, %16 : vector<8x128xbf16>
    %c0_12 = arith.constant 0 : index
    %c0_13 = arith.constant 0 : index
    %18 = vector.load %arg6[%c0_12, %c0_13] : memref<128x8xbf16, #tpu.memory_space<vmem>>, vector<128x8xbf16>
    %cst_14 = arith.constant dense<0.000000e+00> : vector<8x8xf32>
    %19 = tpu.matmul %17, %18, %cst_14 {dimension_numbers = #tpu.dot_dimension_numbers<[1], [0], [0], [1], [0, 0, 1, 1], [], []>} : vector<8x128xbf16>, vector<128x8xbf16>, vector<8x8xf32> -> vector<8x8xf32>
    %c0_15 = arith.constant 0 : index
    %c0_16 = arith.constant 0 : index
    %20 = vector.load %arg7[%c0_15, %c0_16] : memref<1x8xf32, #tpu.memory_space<vmem>>, vector<1x8xf32>
    %21 = vector.broadcast %20 : vector<1x8xf32> to vector<8x8xf32>
    %22 = arith.addf %19, %21 : vector<8x8xf32>
    %23 = math.tanh %22 : vector<8x8xf32>
    %cst_17 = arith.constant 2.000000e+00 : f32
    %24 = vector.broadcast %cst_17 : f32 to vector<8x8xf32>
    %25 = arith.mulf %23, %24 : vector<8x8xf32>
    %c0_18 = arith.constant 0 : index
    %c0_19 = arith.constant 0 : index
    %26 = vector.load %arg8[%c0_18, %c0_19] : memref<8x8xf32, #tpu.memory_space<vmem>>, vector<8x8xf32>
    tpu.vector_store %arg8[%c0_18, %c0_19], %25 {strides = array<i32>} : memref<8x8xf32, #tpu.memory_space<vmem>>, vector<8x8xf32>,
    return
  }
  func.func @transform_0(%arg0: i32) -> (i32, i32) {
    %c0_i32 = arith.constant 0 : i32
    %c0_i32_0 = arith.constant 0 : i32
    return %arg0, %c0_i32 : i32, i32
  }
  func.func @transform_1(%arg0: i32) -> (i32, i32) {
    %c0_i32 = arith.constant 0 : i32
    %c0_i32_0 = arith.constant 0 : i32
    %c0_i32_1 = arith.constant 0 : i32
    return %c0_i32, %c0_i32_0 : i32, i32
  }
  func.func @transform_2(%arg0: i32) -> (i32, i32) {
    %c0_i32 = arith.constant 0 : i32
    %c0_i32_0 = arith.constant 0 : i32
    %c0_i32_1 = arith.constant 0 : i32
    return %c0_i32, %c0_i32_0 : i32, i32
  }
  func.func @transform_3(%arg0: i32) -> (i32, i32) {
    %c0_i32 = arith.constant 0 : i32
    %c0_i32_0 = arith.constant 0 : i32
    %c0_i32_1 = arith.constant 0 : i32
    return %c0_i32, %c0_i32_0 : i32, i32
  }
  func.func @transform_4(%arg0: i32) -> (i32, i32) {
    %c0_i32 = arith.constant 0 : i32
    %c0_i32_0 = arith.constant 0 : i32
    %c0_i32_1 = arith.constant 0 : i32
    return %c0_i32, %c0_i32_0 : i32, i32
  }
  func.func @transform_5(%arg0: i32) -> (i32, i32) {
    %c0_i32 = arith.constant 0 : i32
    %c0_i32_0 = arith.constant 0 : i32
    %c0_i32_1 = arith.constant 0 : i32
    return %c0_i32, %c0_i32_0 : i32, i32
  }
  func.func @transform_6(%arg0: i32) -> (i32, i32) {
    %c0_i32 = arith.constant 0 : i32
    %c0_i32_0 = arith.constant 0 : i32
    %c0_i32_1 = arith.constant 0 : i32
    return %c0_i32, %c0_i32_0 : i32, i32
  }
  func.func @transform_7(%arg0: i32) -> (i32, i32) {
    %c0_i32 = arith.constant 0 : i32
    %c0_i32_0 = arith.constant 0 : i32
    return %arg0, %c0_i32 : i32, i32
  }
}

</mosaic_0001>

<bundles_post_ra>
// kernel: tpu_custom_call.1
= control target key start
LH: loop header
LB: loop body
LE: loop exit
PB: predicated region body
PF: predicated region fallthrough
CT: control target
= control target key end

     0   :  { %12 = vsyncpa [#allocation3], 0  ;;  %s674_s0 = inlined_call_operand.hbm [shape: f32[8,24], index: 0, kind: input, shape index: {}]   ;;  %s675_s1 = inlined_call_operand.vmem [shape: bf16[24,128], index: 1, kind: input, shape index: {}]   ;;  %s676_s2 = inlined_call_operand.vmem [shape: f32[1,128], index: 2, kind: input, shape index: {}]   ;;  %s677_s3 = inlined_call_operand.vmem [shape: bf16[128,128], index: 3, kind: input, shape index: {}]   ;;  %s678_s4 = inlined_call_operand.vmem [shape: f32[1,128], index: 4, kind: input, shape index: {}]   ;;  %s679_s5 = inlined_call_operand.vmem [shape: bf16[128,8], index: 5, kind: input, shape index: {}]   ;;  %s680_s6 = inlined_call_operand.vmem [shape: f32[1,8], index: 6, kind: input, shape index: {}]   ;;  %s681_s7 = inlined_call_operand.hbm [shape: f32[8,8], index: 7, kind: output, shape index: {}]  }
   0x1   :  { %13 = vsyncpa [#allocation4], 0  ;;  %s518_s24 = smov [#allocation2]   ;;  %s470_s28 = scalar_lea.hbm %s674_s0, 128 }
   0x2   :  { %s20_s25 = sshll.u32 %s518_s24, 4  ;;  %p471_p0 = scmp.ne.s32.totalorder %s674_s0, %s470_s28  ;;  %s21_s25 = int_to_ptr.vmem [resolvable:$true] %s20_s25 }
   0x3   :  { %p474_p1 = scmp.lt.u32.totalorder %s470_s28, %s674_s0 }
   0x5   :  { %p476_p2 = pnand %p474_p1, %p471_p0 }
   0x7   :  { %479 = shalt.err (!%p476_p2)
}
   0x8   :  { %s480_s10 = scalar_lea.vmem %s21_s25, 128  ;;  %p485_p4 = scmp.lt.s32.totalorder %s21_s25, %s21_s25 }
   0x9   :  { %p481_p3 = scmp.ne.s32.totalorder %s21_s25, %s480_s10  ;;  %p486_p5 = scmp.lt.s32.totalorder %s480_s10, %s480_s10 }
   0xb   :  { %p487_p6 = por %p486_p5, %p485_p4 }
   0xd   :  { %p488_p7 = pnand %p487_p6, %p481_p3 }
   0xf   :  { %491 = shalt.err (!%p488_p7)
}
  0x10   :  { %23 = dma.hbm_to_vmem [thread:$0]  %s674_s0, 128, %s21_s25, [#allocation3]  }
  0x11   :  { %514 = dma.done.wait [#allocation3], 128  }
  0x12   :  { %515 = vsyncadd [#allocation3], 4294967168  ;;  %v519_v0 = vmov 0.0   ;;  %vm520_vm0 = vmmov 0   ;;  %v450_v1 = vld [vmem:[%s675_s1] sm:$0xff]   ;;  %vm65_vm1 = vcmask 1043456  }
  0x13   :  { %397 = vmatprep.subr.bf16.mxu0 %v519_v0  ;;  %401 = vmatprep.mubr.msk.bf16.mxu0 %vm520_vm0, %v519_v0  ;;  %v451_v2 = vld [vmem:[%s675_s1 + $0x8] ss:$0 sps:$4 sm:$0xff]   ;;  %v40_v3 = vld [vmem:[#allocation2] sm:$0xff]  ;;  %vm61_vm2 = vcmask 195584   ;;  %v454_v8 = vld [vmem:[%s677_s3 + $0x10] sm:$0xff]   ;;  %v521_v27 = vmov 0  }
  0x14   :  { %405 = vmatprep.subr.bf16.mxu1 %v519_v0  ;;  %421 = vmatprep.mubr.msk.bf16.mxu1 %vm520_vm0, %v519_v0  ;;  %v452_v4 = vld [vmem:[%s677_s3] sm:$0xff]   ;;  %v67_v5 = vsel %vm65_vm1, %v451_v2, 0  ;;  %v453_v6 = vld [vmem:[%s677_s3 + $0x8] sm:$0xff]   ;;  %v41_v7 = vpack.c.bf16 %v40_v3, %v40_v3  ;;  %v455_v9 = vld [vmem:[%s677_s3 + $0x18] sm:$0xff]   ;;  %vm337_vm3 = vcmask 64512  }
  0x15   :  { %398 = vmatpush3.bf16.msra.mxu0 %v450_v1  ;;  %406 = vmatpush3.bf16.msra.mxu1 %v452_v4  ;;  %v456_v10 = vld [vmem:[%s677_s3 + $0x20] sm:$0xff]   ;;  %v457_v11 = vld [vmem:[%s677_s3 + $0x28] sm:$0xff]   ;;  %v458_v12 = vld [vmem:[%s677_s3 + $0x30] sm:$0xff]  }
  0x16   :  { %399 = vmatprep.subr.bf16.mxu0 %v519_v0  ;;  %407 = vmatprep.subr.bf16.mxu1 %v519_v0  ;;  %v459_v13 = vld [vmem:[%s677_s3 + $0x38] sm:$0xff]   ;;  %v460_v14 = vld [vmem:[%s679_s5] sm:$0xff]   ;;  %v461_v15 = vld [vmem:[%s679_s5 + $0x8] sm:$0xff]  }
  0x17   :  { %v462_v16 = vld [vmem:[%s679_s5 + $0x10] sm:$0xff]   ;;  %v463_v17 = vld [vmem:[%s679_s5 + $0x18] sm:$0xff]   ;;  %v464_v18 = vld [vmem:[%s679_s5 + $0x20] sm:$0xff]  }
  0x18   :  { %v465_v19 = vld [vmem:[%s679_s5 + $0x28] sm:$0xff]   ;;  %v354_v20 = vld [vmem:[%s676_s2] ss:$0 sm:$0xff]  ;;  %v466_v29 = vld [vmem:[%s679_s5 + $0x30] sm:$0xff]  }
  0x19   :  { %400 = vmatpush3.bf16.msra.mxu0 %v67_v5  ;;  %408 = vmatpush3.bf16.msra.mxu1 %v453_v6  ;;  %v467_v30 = vld [vmem:[%s679_s5 + $0x38] sm:$0xff]   ;;  %v358_v31 = vld [vmem:[%s678_s4] ss:$0 sm:$0xff]  ;;  %s522_s5 = smov [#allocation5]  }
  0x1a   :  { %425 = vmatprep.subr.bf16.mxu0 %v519_v0  ;;  %409 = vmatprep.subr.bf16.mxu1 %v519_v0  ;;  %v367_v39 = vld [vmem:[%s680_s6] ss:$0 sm:$0xff]  ;;  %s345_s4 = sshll.u32 %s522_s5, 4  ;;  %s346_s4 = int_to_ptr.vmem [resolvable:$true] %s345_s4 }
  0x1b   :  { %s492_s26 = scalar_lea.vmem %s346_s4, 128  ;;  %p497_p9 = scmp.lt.s32.totalorder %s346_s4, %s346_s4 }
  0x1c   :  { %402 = vmatmul.mubr.msk.bf16.vlgmr.msra.gmra.mrb[0].mxu0 %vm61_vm2, %v41_v7  ;;  %p493_p8 = scmp.ne.s32.totalorder %s346_s4, %s492_s26  ;;  %p498_p10 = scmp.lt.s32.totalorder %s492_s26, %s492_s26 }
  0x1d   :  { %441 = vmatprep.mubr.msk.bf16.mxu0 %vm520_vm0, %v519_v0  ;;  %410 = vmatpush3.bf16.msra.mxu1 %v454_v8 }
  0x1e   :  { %411 = vmatprep.subr.bf16.mxu1 %v519_v0  ;;  %426 = vmatpush3.bf16.msra.mxu0 %v460_v14  ;;  %p499_p11 = por %p498_p10, %p497_p9 }
  0x1f   :  { %427 = vmatprep.subr.bf16.mxu0 %v519_v0 }
  0x20   :  { %p500_p12 = pnand %p499_p11, %p493_p8 }
  0x21   :  { %412 = vmatpush3.bf16.msra.mxu1 %v455_v9 }
  0x22   :  { %413 = vmatprep.subr.bf16.mxu1 %v519_v0  ;;  %428 = vmatpush3.bf16.msra.mxu0 %v461_v15 }
  0x23   :  { %429 = vmatprep.subr.bf16.mxu0 %v519_v0 }
  0x25   :  { %414 = vmatpush3.bf16.msra.mxu1 %v456_v10 }
  0x26   :  { %415 = vmatprep.subr.bf16.mxu1 %v519_v0  ;;  %430 = vmatpush3.bf16.msra.mxu0 %v462_v16 }
  0x27   :  { %431 = vmatprep.subr.bf16.mxu0 %v519_v0 }
  0x29   :  { %416 = vmatpush3.bf16.msra.mxu1 %v457_v11 }
  0x2a   :  { %417 = vmatprep.subr.bf16.mxu1 %v519_v0  ;;  %432 = vmatpush3.bf16.msra.mxu0 %v463_v17 }
  0x2b   :  { %433 = vmatprep.subr.bf16.mxu0 %v519_v0 }
  0x2d   :  { %418 = vmatpush3.bf16.msra.mxu1 %v458_v12 }
  0x2e   :  { %419 = vmatprep.subr.bf16.mxu1 %v519_v0  ;;  %434 = vmatpush3.bf16.msra.mxu0 %v464_v18 }
  0x2f   :  { %435 = vmatprep.subr.bf16.mxu0 %v519_v0 }
  0x31   :  { %420 = vmatpush3.bf16.msra.mxu1 %v459_v13 }
  0x32   :  { %436 = vmatpush3.bf16.msra.mxu0 %v465_v19 }
  0x33   :  { %437 = vmatprep.subr.bf16.mxu0 %v519_v0 }
  0x36   :  { %438 = vmatpush3.bf16.msra.mxu0 %v466_v29 }
  0x37   :  { %439 = vmatprep.subr.bf16.mxu0 %v519_v0 }
  0x3a   :  { %440 = vmatpush3.bf16.msra.mxu0 %v467_v30 }
  0xef   :  { %v103_v21 = vpop.f32.mrb[0].mxu0 }
  0xf0   :  { %v104_v22 = vadd.f32 %v354_v20, %v103_v21  ;;  %v403_v23 = vpop.f32.mrb[1].mxu0 }
  0xf1   :  { %v106_v24 = vpop.f32.mrb[2].mxu0 }
  0xf2   :  { %v109_v25 = vpack.c.bf16 %v104_v22, %v104_v22  ;;  %v404_v26 = vpop.f32.mrb[3].mxu0 }
  0xf4   :  { %v110_v28 = vmax.bf16 %v521_v27, %v109_v25 }
  0xf6   :  { %422 = vmatmul.mubr.bf16.vlgmr.msra.gmra.mrb[0].mxu1 %v110_v28 }
 0x1c9   :  { %v216_v32 = vpop.f32.mrb[0].mxu1 }
 0x1ca   :  { %v217_v33 = vadd.f32 %v358_v31, %v216_v32  ;;  %v423_v34 = vpop.f32.mrb[1].mxu1 }
 0x1cb   :  { %v219_v35 = vpop.f32.mrb[2].mxu1 }
 0x1cc   :  { %v222_v36 = vpack.c.bf16 %v217_v33, %v217_v33  ;;  %v424_v37 = vpop.f32.mrb[3].mxu1 }
 0x1ce   :  { %v223_v38 = vmax.bf16 %v521_v27, %v222_v36 }
 0x1d0   :  { %442 = vmatmul.mubr.bf16.vlgmr.msra.gmra.mrb[4].mxu0 %v223_v38 }
 0x2a3   :  { %v329_v40 = vpop.f32.mrb[4].mxu0 }
 0x2a4   :  { %v330_v41 = vadd.f32 %v367_v39, %v329_v40  ;;  %v443_v42 = vpop.f32.mrb[5].mxu0 }
 0x2a5   :  { %v332_v43 = vpop.f32.mrb[6].mxu0 }
 0x2a6   :  { %468 = vtanh.f32 %v330_v41  ;;  %v444_v44 = vpop.f32.mrb[7].mxu0 }
 0x2b0   :  { %v469_v45 = vpop.eup %468 }
 0x2b1   :  { %v336_v46 = vmul.f32 2.0, %v469_v45 }
 0x2b3   :  { %338 = vst.msk [vmem:[#allocation5] sm:$0xff] %vm337_vm3, %v336_v46 }
 0x2b4   :  { %503 = shalt.err (!%p500_p12)
}
 0x2b5   :  { %s504_s28 = scalar_lea.hbm %s681_s7, 128 }
 0x2b6   :  { %p505_p13 = scmp.ne.s32.totalorder %s681_s7, %s504_s28  ;;  %p508_p0 = scmp.lt.u32.totalorder %s504_s28, %s681_s7 }
 0x2b8   :  { %p510_p1 = pnand %p508_p0, %p505_p13 }
 0x2ba   :  { %513 = shalt.err (!%p510_p1)
}
 0x2bb   :  { %348 = dma.vmem_to_hbm [thread:$0]  %s346_s4, 128, %s681_s7, [#allocation4]  }
 0x2bc   :  { %516 = dma.done.wait [#allocation4], 128  }
 0x2bd   :  { %517 = vsyncadd [#allocation4], 4294967168 }
 0x2be   :  { %352 = vsyncpa [#allocation3], 1 }
 0x2bf   :  { %353 = vsyncpa [#allocation4], 1 }

</bundles_post_ra>
